<compile_context>
chip_gen: v7x
topology: tpu7x:2x2x1
jax: 0.10.0
libtpu: 0.0.40
codegen_flags: <defaults>
</compile_context>

<pallas_src>
import numpy as np
import jax
import jax.numpy as jnp
from jax import lax
from jax.experimental import pallas as pl
from jax.experimental.pallas import tpu as pltpu


def _pool_matrix(in_size: int, out_size: int) -> np.ndarray:
    """(out_size, in_size) averaging matrix matching adaptive_avg_pool1d windows."""
    m = np.zeros((out_size, in_size), dtype=np.float32)
    for i in range(out_size):
        start = (i * in_size) // out_size
        end = -((-(i + 1) * in_size) // out_size)  # ceil((i+1)*in/out)
        m[i, start:end] = 1.0 / float(end - start)
    return m


# ----------------------------------------------------------------------------
# Kernel bodies
# ----------------------------------------------------------------------------
def _area_resize_kernel(pwt_ref, ph_ref, x_ref, o_ref):
    # pwt_ref: (W, S) input-dtype  column-pool matrix, transposed (resident)
    # ph_ref : (S, H) float32      row-pool matrix (resident)
    # x_ref  : (B, H, W)           B image planes for this grid step
    # o_ref  : (B, S, S)
    x = x_ref[...]  # native dtype; MXU accumulates in f32 via preferred_element_type

    # W-pool: contract x's minor (lane) dim against pwt -- effectively one big
    # matmul with M = B*H rows, no broadcast and no reshape needed.
    tmp = lax.dot_general(x, pwt_ref[...], (((2,), (0,)), ((), ())),
                          preferred_element_type=jnp.float32)        # (B, H, S) f32

    # H-pool: contract over H against the shared (S, H) matrix, no broadcast.
    # Result is per-plane transposed, (B, S_j, S_i); fix with a cheap minor
    # (lane<->sublane) transpose of the small result -- keeps the stored output
    # plane-major so no extra XLA transpose pass over HBM is needed.
    r = lax.dot_general(tmp, ph_ref[...], (((1,), (1,)), ((), ())),
                        preferred_element_type=jnp.float32)          # (B, S_j, S_i)
    o_ref[...] = jnp.swapaxes(r, 1, 2).astype(o_ref.dtype)           # (B, S_i, S_j)


def _area_resize_kernel_compat(pwt_ref, ph_ref, x_ref, o_ref):
    # Fallback body using only long-proven lowering forms (2D matmul and
    # batched 3D x 3D dot_general).  Slightly more VMEM (materialized ph
    # broadcast) but guaranteed to lower; used only if the fast body fails.
    B, H, W = x_ref.shape
    S = pwt_ref.shape[1]
    x = x_ref[...]
    if H % 8 == 0:
        tmp = jnp.dot(x.reshape(B * H, W), pwt_ref[...],
                      preferred_element_type=jnp.float32).reshape(B, H, S)
    else:
        pwt_b = jnp.broadcast_to(pwt_ref[...], (B, W, S))
        tmp = lax.dot_general(x, pwt_b, (((2,), (1,)), ((0,), (0,))),
                              preferred_element_type=jnp.float32)    # (B, H, S)
    ph_b = jnp.broadcast_to(ph_ref[...], (B, S, H)).astype(jnp.float32)
    out = lax.dot_general(ph_b, tmp, (((2,), (1,)), ((0,), (0,))),
                          preferred_element_type=jnp.float32)        # (B, S, S)
    o_ref[...] = out.astype(o_ref.dtype)


# ----------------------------------------------------------------------------
# Chip-aware sizing
# ----------------------------------------------------------------------------
def _chip_params():
    """Returns (vmem_capacity_bytes, tensorcores_per_device) with safe fallbacks."""
    kind = ""
    try:
        kind = jax.devices()[0].device_kind.lower()
    except Exception:
        pass
    is_v7 = "7" in kind
    try:
        cap = int(pltpu.get_tpu_info().vmem_capacity_bytes)
    except Exception:
        cap = (64 << 20) if is_v7 else (128 << 20)   # v7x: 64 MiB / TC, else 128 MiB
    cores = 2 if (is_v7 or "v4" in kind) else 1
    return cap, cores


def _choose_block_planes(nc, h, w, s, dtype, vmem_budget, dual_core):
    """Planes per grid step: largest B whose tiled VMEM footprint fits the budget."""
    it = jnp.dtype(dtype).itemsize
    pack = max(8, 32 // it)                    # sublane pack: 8 f32, 16 bf16, 32 int8
    rup = lambda n, m: -(-int(n) // m) * m
    # Tile-rounded per-plane footprint (double-buffered input and output,
    # f32 intermediate, f32 result + transposed copy).
    in_plane = rup(h, pack) * rup(w, 128) * it
    tmp_plane = rup(h, 8) * rup(s, 128) * 4
    r_plane = rup(s, 8) * rup(s, 128) * 4
    out_plane = rup(s, pack) * rup(s, 128) * it
    per_plane = 2 * in_plane + tmp_plane + 2 * r_plane + 2 * out_plane
    resident = rup(w, pack) * rup(s, 128) * it + rup(s, 8) * rup(h, 128) * 4
    # ~70% of the scoped limit for pipeline buffers; the rest is compiler slack.
    avail = int(vmem_budget * 0.7) - 2 * resident
    b = max(1, avail // max(per_plane, 1))
    b = min(b, nc, 1024)
    if dual_core and nc >= 2:
        # Keep >= 2 grid steps so both TensorCores get work under "parallel".
        b = min(b, -(-nc // 2))
    return max(1, int(b))


# ----------------------------------------------------------------------------
# Wrapper
# ----------------------------------------------------------------------------
_FAST_PATH_OK = None  # cache: does the rank-3 x rank-2 dot_general body lower?


def area_resize(img: jnp.ndarray, output_size: int, block_planes=None) -> jnp.ndarray:
    """Equivalent of AreaResize(output_size)(img) for NCHW inputs."""
    global _FAST_PATH_OK
    N, C, H, W = img.shape
    S = int(output_size)
    NC = N * C
    dtype = img.dtype

    # Pooling matrices (exact f32 window weights, built host-side).
    pwt = jnp.asarray(_pool_matrix(W, S).T, dtype=dtype)       # (W, S) input dtype
    ph = jnp.asarray(_pool_matrix(H, S), dtype=jnp.float32)    # (S, H) f32

    cap, cores = _chip_params()
    vmem_limit = int(cap * 3 // 4)   # 96 MiB on v5e/v6e, 48 MiB on v7x (headroom)

    if block_planes is None:
        B = _choose_block_planes(NC, H, W, S, dtype, vmem_limit, cores > 1)
    else:
        B = int(block_planes)
    B = max(1, min(B, NC))
    num_blocks = pl.cdiv(NC, B)      # ragged last block: masked by Pallas, no pad

    x = img.reshape(NC, H, W)        # free (leading-dims collapse)

    def _call(kernel_body):
        return pl.pallas_call(
            kernel_body,
            out_shape=jax.ShapeDtypeStruct((NC, S, S), dtype),
            grid_spec=pltpu.PrefetchScalarGridSpec(
                num_scalar_prefetch=0,
                grid=(num_blocks,),
                in_specs=[
                    pl.BlockSpec((W, S), lambda i: (0, 0)),        # P_w^T (resident)
                    pl.BlockSpec((S, H), lambda i: (0, 0)),        # P_h   (resident)
                    pl.BlockSpec((B, H, W), lambda i: (i, 0, 0)),  # B planes / step
                ],
                out_specs=pl.BlockSpec((B, S, S), lambda i: (i, 0, 0)),
            ),
            compiler_params=pltpu.CompilerParams(
                dimension_semantics=("parallel",),
                vmem_limit_bytes=vmem_limit,
            ),
        )(pwt, ph, x)

    use_fast = _FAST_PATH_OK is not False
    try:
        out = _call(_area_resize_kernel if use_fast else _area_resize_kernel_compat)
        if _FAST_PATH_OK is None:
            _FAST_PATH_OK = use_fast
    except Exception:
        if not use_fast:
            raise
        _FAST_PATH_OK = False
        out = _call(_area_resize_kernel_compat)

    return out.reshape(N, C, S, S)


# ----------------------------------------------------------------------------
# Self-test
# ----------------------------------------------------------------------------
if __name__ == "__main__":
    key = jax.random.PRNGKey(0)

    # Case 1: small NCHW image, S divides H (shapes consistent with the module).
    N, C, H = 2, 4, 16
    S = 8
    x = jax.random.normal(key, (N, C, H, H), dtype=jnp.float32)
    y = jax.block_until_ready(area_resize(x, S))
    ph_np = _pool_matrix(H, S).astype(np.float64)
    ref = np.einsum("oh,nchw,pw->ncop", ph_np, np.asarray(x, np.float64), ph_np)
    assert y.shape == (N, C, S, S)
    assert np.allclose(np.asarray(y, np.float64), ref, atol=1e-5, rtol=1e-5)

    # Case 2: overlapping adaptive windows (H % S != 0) and a ragged last grid
    # block (NC % B != 0) -- exercises the no-pad masked-tail path.
    N2, C2, H2, S2 = 1, 3, 24, 7
    x2 = jax.random.normal(jax.random.PRNGKey(1), (N2, C2, H2, H2), dtype=jnp.float32)
    y2 = jax.block_until_ready(area_resize(x2, S2, block_planes=2))
    ph2_np = _pool_matrix(H2, S2).astype(np.float64)
    ref2 = np.einsum("oh,nchw,pw->ncop", ph2_np, np.asarray(x2, np.float64), ph2_np)
    assert y2.shape == (N2, C2, S2, S2)
    assert np.allclose(np.asarray(y2, np.float64), ref2, atol=1e-5, rtol=1e-5)

    print("KERNEL_OK")
</pallas_src>

<mosaic_0001>
module attributes {stable_mosaic.version = 11 : i64} {
  func.func @_area_resize_kernel(%arg0: i32, %arg1: memref<16x8xf32, #tpu.memory_space<vmem>>, %arg2: memref<8x16xf32, #tpu.memory_space<vmem>>, %arg3: memref<8x16x16xf32, #tpu.memory_space<vmem>>, %arg4: memref<8x8x8xf32, #tpu.memory_space<vmem>>) attributes {dimension_semantics = [#tpu.dimension_semantics<parallel>], iteration_bounds = array<i64: 1>, scalar_prefetch = 0 : i64, scratch_operands = 0 : i64, tpu.core_type = #tpu.core_type<tc>, window_params = [{pipeline_mode = #tpu.pipeline_mode<synchronous>, transform_indices = @transform_0, window_bounds = array<i64: 16, 8>}, {pipeline_mode = #tpu.pipeline_mode<synchronous>, transform_indices = @transform_1, window_bounds = array<i64: 8, 16>}, {transform_indices = @transform_2, window_bounds = array<i64: 8, 16, 16>}, {transform_indices = @transform_3, window_bounds = array<i64: 8, 8, 8>}]} {
    %c0 = arith.constant 0 : index
    %c0_0 = arith.constant 0 : index
    %c0_1 = arith.constant 0 : index
    %0 = vector.load %arg3[%c0, %c0_0, %c0_1] : memref<8x16x16xf32, #tpu.memory_space<vmem>>, vector<8x16x16xf32>
    %c0_2 = arith.constant 0 : index
    %c0_3 = arith.constant 0 : index
    %1 = vector.load %arg1[%c0_2, %c0_3] : memref<16x8xf32, #tpu.memory_space<vmem>>, vector<16x8xf32>
    %cst = arith.constant dense<0.000000e+00> : vector<8x16x8xf32>
    %2 = tpu.matmul %0, %1, %cst {dimension_numbers = #tpu.dot_dimension_numbers<[2], [0], [0, 1], [1], [0, 0, 0, 1, 1, 1], [], []>} : vector<8x16x16xf32>, vector<16x8xf32>, vector<8x16x8xf32> -> vector<8x16x8xf32>
    %c0_4 = arith.constant 0 : index
    %c0_5 = arith.constant 0 : index
    %3 = vector.load %arg2[%c0_4, %c0_5] : memref<8x16xf32, #tpu.memory_space<vmem>>, vector<8x16xf32>
    %cst_6 = arith.constant dense<0.000000e+00> : vector<8x8x8xf32>
    %4 = tpu.matmul %2, %3, %cst_6 {dimension_numbers = #tpu.dot_dimension_numbers<[1], [1], [0, 2], [0], [0, 0, 0, 2, 1, 0], [], []>} : vector<8x16x8xf32>, vector<8x16xf32>, vector<8x8x8xf32> -> vector<8x8x8xf32>
    %5 = tpu.transpose %4, [0, 2, 1] : vector<8x8x8xf32> -> vector<8x8x8xf32>
    %c0_7 = arith.constant 0 : index
    %c0_8 = arith.constant 0 : index
    %c0_9 = arith.constant 0 : index
    %6 = vector.load %arg4[%c0_7, %c0_8, %c0_9] : memref<8x8x8xf32, #tpu.memory_space<vmem>>, vector<8x8x8xf32>
    tpu.vector_store %arg4[%c0_7, %c0_8, %c0_9], %5 {strides = array<i32>} : memref<8x8x8xf32, #tpu.memory_space<vmem>>, vector<8x8x8xf32>,
    return
  }
  func.func @transform_0(%arg0: i32) -> (i32, i32) {
    %c0_i32 = arith.constant 0 : i32
    %c0_i32_0 = arith.constant 0 : i32
    %c0_i32_1 = arith.constant 0 : i32
    return %c0_i32, %c0_i32_0 : i32, i32
  }
  func.func @transform_1(%arg0: i32) -> (i32, i32) {
    %c0_i32 = arith.constant 0 : i32
    %c0_i32_0 = arith.constant 0 : i32
    %c0_i32_1 = arith.constant 0 : i32
    return %c0_i32, %c0_i32_0 : i32, i32
  }
  func.func @transform_2(%arg0: i32) -> (i32, i32, i32) {
    %c0_i32 = arith.constant 0 : i32
    %c0_i32_0 = arith.constant 0 : i32
    %c0_i32_1 = arith.constant 0 : i32
    return %arg0, %c0_i32, %c0_i32_0 : i32, i32, i32
  }
  func.func @transform_3(%arg0: i32) -> (i32, i32, i32) {
    %c0_i32 = arith.constant 0 : i32
    %c0_i32_0 = arith.constant 0 : i32
    %c0_i32_1 = arith.constant 0 : i32
    return %arg0, %c0_i32, %c0_i32_0 : i32, i32, i32
  }
}

module attributes {stable_mosaic.version = 11 : i64} {
  func.func @_area_resize_kernel_compat(%arg0: i32, %arg1: memref<16x8xf32, #tpu.memory_space<vmem>>, %arg2: memref<8x16xf32, #tpu.memory_space<vmem>>, %arg3: memref<8x16x16xf32, #tpu.memory_space<vmem>>, %arg4: memref<8x8x8xf32, #tpu.memory_space<vmem>>) attributes {dimension_semantics = [#tpu.dimension_semantics<parallel>], iteration_bounds = array<i64: 1>, scalar_prefetch = 0 : i64, scratch_operands = 0 : i64, tpu.core_type = #tpu.core_type<tc>, window_params = [{pipeline_mode = #tpu.pipeline_mode<synchronous>, transform_indices = @transform_0, window_bounds = array<i64: 16, 8>}, {pipeline_mode = #tpu.pipeline_mode<synchronous>, transform_indices = @transform_1, window_bounds = array<i64: 8, 16>}, {transform_indices = @transform_2, window_bounds = array<i64: 8, 16, 16>}, {transform_indices = @transform_3, window_bounds = array<i64: 8, 8, 8>}]} {
    %c0 = arith.constant 0 : index
    %c0_0 = arith.constant 0 : index
    %c0_1 = arith.constant 0 : index
    %0 = vector.load %arg3[%c0, %c0_0, %c0_1] : memref<8x16x16xf32, #tpu.memory_space<vmem>>, vector<8x16x16xf32>
    %1 = vector.shape_cast %0 : vector<8x16x16xf32> to vector<128x16xf32>
    %c0_2 = arith.constant 0 : index
    %c0_3 = arith.constant 0 : index
    %2 = vector.load %arg1[%c0_2, %c0_3] : memref<16x8xf32, #tpu.memory_space<vmem>>, vector<16x8xf32>
    %cst = arith.constant dense<0.000000e+00> : vector<128x8xf32>
    %3 = tpu.matmul %1, %2, %cst {dimension_numbers = #tpu.dot_dimension_numbers<[1], [0], [0], [1], [0, 0, 1, 1], [], []>} : vector<128x16xf32>, vector<16x8xf32>, vector<128x8xf32> -> vector<128x8xf32>
    %4 = vector.shape_cast %3 : vector<128x8xf32> to vector<8x16x8xf32>
    %c0_4 = arith.constant 0 : index
    %c0_5 = arith.constant 0 : index
    %5 = vector.load %arg2[%c0_4, %c0_5] : memref<8x16xf32, #tpu.memory_space<vmem>>, vector<8x16xf32>
    %6 = vector.shape_cast %5 : vector<8x16xf32> to vector<1x8x16xf32>
    %7 = vector.broadcast %6 : vector<1x8x16xf32> to vector<8x8x16xf32>
    %cst_6 = arith.constant dense<0.000000e+00> : vector<8x8x8xf32>
    %8 = tpu.matmul %7, %4, %cst_6 {dimension_numbers = #tpu.dot_dimension_numbers<[2], [1], [1], [2], [0, 0, 0, 1, 1, 2], [0], [0]>} : vector<8x8x16xf32>, vector<8x16x8xf32>, vector<8x8x8xf32> -> vector<8x8x8xf32>
    %c0_7 = arith.constant 0 : index
    %c0_8 = arith.constant 0 : index
    %c0_9 = arith.constant 0 : index
    %9 = vector.load %arg4[%c0_7, %c0_8, %c0_9] : memref<8x8x8xf32, #tpu.memory_space<vmem>>, vector<8x8x8xf32>
    tpu.vector_store %arg4[%c0_7, %c0_8, %c0_9], %8 {strides = array<i32>} : memref<8x8x8xf32, #tpu.memory_space<vmem>>, vector<8x8x8xf32>,
    return
  }
  func.func @transform_0(%arg0: i32) -> (i32, i32) {
    %c0_i32 = arith.constant 0 : i32
    %c0_i32_0 = arith.constant 0 : i32
    %c0_i32_1 = arith.constant 0 : i32
    return %c0_i32, %c0_i32_0 : i32, i32
  }
  func.func @transform_1(%arg0: i32) -> (i32, i32) {
    %c0_i32 = arith.constant 0 : i32
    %c0_i32_0 = arith.constant 0 : i32
    %c0_i32_1 = arith.constant 0 : i32
    return %c0_i32, %c0_i32_0 : i32, i32
  }
  func.func @transform_2(%arg0: i32) -> (i32, i32, i32) {
    %c0_i32 = arith.constant 0 : i32
    %c0_i32_0 = arith.constant 0 : i32
    %c0_i32_1 = arith.constant 0 : i32
    return %arg0, %c0_i32, %c0_i32_0 : i32, i32, i32
  }
  func.func @transform_3(%arg0: i32) -> (i32, i32, i32) {
    %c0_i32 = arith.constant 0 : i32
    %c0_i32_0 = arith.constant 0 : i32
    %c0_i32_1 = arith.constant 0 : i32
    return %arg0, %c0_i32, %c0_i32_0 : i32, i32, i32
  }
}

</mosaic_0001>

<bundles_post_ra>
// kernel: tpu_custom_call.1
= control target key start
LH: loop header
LB: loop body
LE: loop exit
PB: predicated region body
PF: predicated region fallthrough
CT: control target
= control target key end

     0   :  { %8 = vsyncpa [#allocation3], 0  ;;  %s1263_s0 = inlined_call_operand.hbm [shape: f32[16,8], index: 0, kind: input, shape index: {}]   ;;  %s1264_s1 = inlined_call_operand.hbm [shape: f32[8,16], index: 1, kind: input, shape index: {}]   ;;  %s1265_s2 = inlined_call_operand.hbm [shape: f32[8,16,16], index: 2, kind: input, shape index: {}]   ;;  %s1266_s3 = inlined_call_operand.hbm [shape: f32[8,8,8], index: 3, kind: output, shape index: {}]  }
   0x1   :  { %9 = vsyncpa [#allocation6], 0 }
   0x2   :  { %10 = vsyncpa [#allocation4], 0  ;;  %s1139_s12 = smov [#allocation5]   ;;  %s1140_s14 = smov [#allocation2]  }
   0x3   :  { %s29_s13 = sshll.u32 %s1139_s12, 4  ;;  %s16_s15 = sshll.u32 %s1140_s14, 4  ;;  %s30_s13 = int_to_ptr.vmem [resolvable:$true] %s29_s13  ;;  %s1165_s15 = int_to_ptr.vmem [resolvable:$true] %s16_s15 }
   0x4   :  { %s1045_s18 = scalar_lea.hbm %s1264_s1, 128 }
   0x5   :  { %p1046_p0 = scmp.ne.s32.totalorder %s1264_s1, %s1045_s18  ;;  %p1049_p1 = scmp.lt.u32.totalorder %s1045_s18, %s1264_s1 }
   0x7   :  { %p1051_p2 = pnand %p1049_p1, %p1046_p0 }
   0x9   :  { %1054 = shalt.err (!%p1051_p2)
}
   0xa   :  { %s1055_s23 = scalar_lea.vmem %s30_s13, 128  ;;  %p1060_p4 = scmp.lt.s32.totalorder %s30_s13, %s30_s13 }
   0xb   :  { %p1056_p3 = scmp.ne.s32.totalorder %s30_s13, %s1055_s23  ;;  %p1061_p5 = scmp.lt.s32.totalorder %s1055_s23, %s1055_s23 }
   0xd   :  { %p1062_p6 = por %p1061_p5, %p1060_p4 }
   0xf   :  { %p1063_p7 = pnand %p1062_p6, %p1056_p3 }
  0x11   :  { %1066 = shalt.err (!%p1063_p7)
}
  0x12   :  { %32 = dma.hbm_to_vmem [thread:$0]  %s1264_s1, 128, %s30_s13, [#allocation6]  }
  0x13   :  { %s1067_s28 = scalar_lea.hbm %s1263_s0, 256 }
  0x14   :  { %p1068_p8 = scmp.ne.s32.totalorder %s1263_s0, %s1067_s28  ;;  %p1071_p9 = scmp.lt.u32.totalorder %s1067_s28, %s1263_s0 }
  0x16   :  { %p1073_p10 = pnand %p1071_p9, %p1068_p8 }
  0x18   :  { %1076 = shalt.err (!%p1073_p10)
}
  0x19   :  { %s1077_s6 = scalar_lea.vmem %s1165_s15, 256  ;;  %p1082_p12 = scmp.lt.s32.totalorder %s1165_s15, %s1165_s15 }
  0x1a   :  { %p1078_p11 = scmp.ne.s32.totalorder %s1165_s15, %s1077_s6  ;;  %p1083_p13 = scmp.lt.s32.totalorder %s1077_s6, %s1077_s6 }
  0x1c   :  { %p1084_p0 = por %p1083_p13, %p1082_p12 }
  0x1e   :  { %p1085_p1 = pnand %p1084_p0, %p1078_p11 }
  0x20   :  { %1088 = shalt.err (!%p1085_p1)
}
  0x21   :  { %s1141_s1 = smov 128   ;;  %s1142_s7 = smov 8  }
  0x22   :  { %22 = dma.hbm_to_vmem [thread:$0]  %s1263_s0, 256, %s1165_s15, [#allocation3], %s1141_s1, %s1141_s1, %s1142_s7  }
  0x23   :  { %s1143_s10 = smov [#allocation7]   ;;  %s1089_s14 = scalar_lea.hbm %s1265_s2, 2048 }
  0x24   :  { %s38_s11 = sshll.u32 %s1143_s10, 4  ;;  %p1090_p2 = scmp.ne.s32.totalorder %s1265_s2, %s1089_s14  ;;  %s39_s11 = int_to_ptr.vmem [resolvable:$true] %s38_s11 }
  0x25   :  { %p1093_p3 = scmp.lt.u32.totalorder %s1089_s14, %s1265_s2 }
  0x27   :  { %p1095_p4 = pnand %p1093_p3, %p1090_p2 }
  0x29   :  { %1098 = shalt.err (!%p1095_p4)
}
  0x2a   :  { %s1099_s20 = scalar_lea.vmem %s39_s11, 2048  ;;  %p1104_p6 = scmp.lt.s32.totalorder %s39_s11, %s39_s11 }
  0x2b   :  { %p1100_p5 = scmp.ne.s32.totalorder %s39_s11, %s1099_s20  ;;  %p1105_p7 = scmp.lt.s32.totalorder %s1099_s20, %s1099_s20 }
  0x2d   :  { %p1106_p8 = por %p1105_p7, %p1104_p6 }
  0x2f   :  { %p1107_p9 = pnand %p1106_p8, %p1100_p5 }
  0x31   :  { %1110 = shalt.err (!%p1107_p9)
}
  0x32   :  { %44 = dma.hbm_to_vmem [thread:$0]  %s1265_s2, 2048, %s39_s11, [#allocation6], %s1141_s1, %s1141_s1, %s1142_s7  }
  0x33   :  { %1133 = dma.done.wait [#allocation3], 256  }
  0x34   :  { %1134 = vsyncadd [#allocation3], 4294967040 }
  0x35   :  { %1135 = dma.done.wait [#allocation6], 2176  }
  0x36   :  { %1136 = vsyncadd [#allocation6], 4294965120  ;;  %vm72_vm0 = vcmask 130048   ;;  %v70_v0 = vld [vmem:[#allocation2] sm:$0xff]  ;;  %v71_v1 = vld [vmem:[#allocation2 + $0x8] sm:$0xff]  ;;  %vm911_vm1 = vcmask 64512  }
  0x37   :  { %v54_v2 = vld [vmem:[#allocation7] sm:$0xff]  ;;  %v1032_v3 = vpack.c.bf16 %v71_v1, %v70_v0  ;;  %v55_v4 = vld [vmem:[#allocation7 + $0x8] sm:$0xff]  ;;  %v56_v6 = vld [vmem:[#allocation7 + $0x10] sm:$0xff]  ;;  %s1144_s2 = smov [#allocation8]  }
  0x38   :  { %994 = vmatprep.mubr.msk.f32.mxu0 %vm72_vm0, %v54_v2  ;;  %v66_v5 = vld [vmem:[#allocation7 + $0x60] sm:$0xff]  ;;  %v67_v7 = vld [vmem:[#allocation7 + $0x68] sm:$0xff]  ;;  %v68_v8 = vld [vmem:[#allocation7 + $0x70] sm:$0xff]  ;;  %s925_s21 = sshll.u32 %s1144_s2, 4  ;;  %s926_s21 = int_to_ptr.vmem [resolvable:$true] %s925_s21 }
  0x39   :  { %1033 = vmatprep.subr.bf16.mxu0 %v1032_v3  ;;  %1036 = vmatprep.subr.bf16.mxu1 %v1032_v3  ;;  %v57_v9 = vld [vmem:[#allocation7 + $0x18] sm:$0xff]  ;;  %v58_v11 = vld [vmem:[#allocation7 + $0x20] sm:$0xff]  ;;  %v59_v12 = vld [vmem:[#allocation7 + $0x28] sm:$0xff]  ;;  %s1111_s22 = scalar_lea.vmem %s926_s21, 1024  ;;  %p1116_p11 = scmp.lt.s32.totalorder %s926_s21, %s926_s21 }
  0x3a   :  { %1035 = vmatpush3.bf16.msra.mxu0 %v1032_v3  ;;  %1037 = vmatpush3.bf16.msra.mxu1 %v1032_v3  ;;  %v69_v10 = vld [vmem:[#allocation7 + $0x78] sm:$0xff]  ;;  %v60_v13 = vld [vmem:[#allocation7 + $0x30] sm:$0xff]  ;;  %v62_v15 = vld [vmem:[#allocation7 + $0x40] sm:$0xff]  ;;  %p1112_p10 = scmp.ne.s32.totalorder %s926_s21, %s1111_s22  ;;  %p1117_p12 = scmp.lt.s32.totalorder %s1111_s22, %s1111_s22 }
  0x3b   :  { %1012 = vmatprep.mubr.msk.f32.mxu1 %vm72_vm0, %v66_v5  ;;  %v61_v14 = vld [vmem:[#allocation7 + $0x38] sm:$0xff]  ;;  %v63_v16 = vld [vmem:[#allocation7 + $0x48] sm:$0xff]  ;;  %v64_v17 = vld [vmem:[#allocation7 + $0x50] sm:$0xff] }
  0x3c   :  { %v65_v18 = vld [vmem:[#allocation7 + $0x58] sm:$0xff]  ;;  %p1118_p13 = por %p1117_p12, %p1116_p11 }
  0x3d   :  { %995 = vmatmul.mubr.msk.f32.vlgmr.msra.gmra.mrb[0].mxu0 %vm72_vm0, %v55_v4  ;;  %1013 = vmatmul.mubr.msk.f32.vlgmr.msra.gmra.mrb[0].mxu1 %vm72_vm0, %v67_v7  ;;  %v266_v19 = vld [vmem:[#allocation5] sm:$0xff] }
  0x3e   :  { %997 = vmatprep.mubr.msk.f32.mxu0 %vm72_vm0, %v56_v6  ;;  %1015 = vmatprep.mubr.msk.f32.mxu1 %vm72_vm0, %v68_v8  ;;  %p1119_p0 = pnand %p1118_p13, %p1112_p10 }
  0x3f   :  { %1018 = vmatprep.subr.msk.mxu1 %vm72_vm0, %v266_v19 }
  0x41   :  { %998 = vmatmul.mubr.msk.f32.gmra.mrb[2].mxu0 %vm72_vm0, %v57_v9  ;;  %1016 = vmatmul.mubr.msk.f32.gmra.mrb[2].mxu1 %vm72_vm0, %v69_v10 }
  0x42   :  { %1000 = vmatprep.mubr.msk.f32.mxu0 %vm72_vm0, %v58_v11 }
  0x43   :  { %1019 = vmatpush3.xpose.msk.msra.mxu1 %vm72_vm0, %v266_v19 }
  0x45   :  { %1001 = vmatmul.mubr.msk.f32.gmra.mrb[4].mxu0 %vm72_vm0, %v59_v12 }
  0x46   :  { %1003 = vmatprep.mubr.msk.f32.mxu0 %vm72_vm0, %v60_v13 }
  0x49   :  { %1004 = vmatmul.mubr.msk.f32.gmra.mrb[6].mxu0 %vm72_vm0, %v61_v14 }
  0x4a   :  { %1006 = vmatprep.mubr.msk.f32.mxu0 %vm72_vm0, %v62_v15 }
  0x4d   :  { %1007 = vmatmul.mubr.msk.f32.gmra.mrb[8].mxu0 %vm72_vm0, %v63_v16 }
  0x4e   :  { %1009 = vmatprep.mubr.msk.f32.mxu0 %vm72_vm0, %v64_v17 }
  0x51   :  { %1010 = vmatmul.mubr.msk.f32.gmra.mrb[10].mxu0 %vm72_vm0, %v65_v18 }
 0x110   :  { %v996_v20 = vpop.f32.mrb[0].mxu0  ;;  %v1014_v21 = vpop.f32.mrb[0].mxu1 }
 0x111   :  { %v187_v22 = vpop.f32.mrb[1].mxu0  ;;  %v247_v23 = vpop.f32.mrb[1].mxu1 }
 0x112   :  { %267 = vxpose.xlu0.b32.start [1/2] (short) (narrow) %v187_v22, 8 }
 0x114   :  { %v999_v24 = vpop.f32.mrb[2].mxu0  ;;  %v1017_v25 = vpop.f32.mrb[2].mxu1 }
 0x115   :  { %v197_v26 = vpop.f32.mrb[3].mxu0  ;;  %v257_v27 = vpop.f32.mrb[3].mxu1 }
 0x116   :  { %268 = vxpose.xlu0.b32.end [2/2] (short) (narrow) %v996_v20, 8  ;;  %299 = vxpose.xlu1.b32.start [1/2] (short) (narrow) %v197_v26, 8 }
 0x118   :  { %v1002_v28 = vpop.f32.mrb[4].mxu0 }
 0x119   :  { %v207_v29 = vpop.f32.mrb[5].mxu0 }
 0x11a   :  { %300 = vxpose.xlu1.b32.end [2/2] (short) (narrow) %v999_v24, 8  ;;  %331 = vxpose.xlu0.b32.start [1/2] (short) (narrow) %v207_v29, 8 }
 0x11c   :  { %v1005_v30 = vpop.f32.mrb[6].mxu0 }
 0x11d   :  { %v217_v31 = vpop.f32.mrb[7].mxu0 }
 0x11e   :  { %332 = vxpose.xlu0.b32.end [2/2] (short) (narrow) %v1002_v28, 8  ;;  %363 = vxpose.xlu1.b32.start [1/2] (short) (narrow) %v217_v31, 8 }
 0x120   :  { %v1008_v32 = vpop.f32.mrb[8].mxu0 }
 0x121   :  { %v227_v33 = vpop.f32.mrb[9].mxu0 }
 0x122   :  { %364 = vxpose.xlu1.b32.end [2/2] (short) (narrow) %v1005_v30, 8  ;;  %395 = vxpose.xlu0.b32.start [1/2] (short) (narrow) %v227_v33, 8 }
 0x124   :  { %v1011_v34 = vpop.f32.mrb[10].mxu0 }
 0x125   :  { %v237_v35 = vpop.f32.mrb[11].mxu0 }
 0x126   :  { %396 = vxpose.xlu0.b32.end [2/2] (short) (narrow) %v1008_v32, 8  ;;  %427 = vxpose.xlu1.b32.start [1/2] (short) (narrow) %v237_v35, 8 }
 0x12a   :  { %459 = vxpose.xlu0.b32.start [1/2] (short) (narrow) %v247_v23, 8  ;;  %428 = vxpose.xlu1.b32.end [2/2] (short) (narrow) %v1011_v34, 8 }
 0x12e   :  { %460 = vxpose.xlu0.b32.end [2/2] (short) (narrow) %v1014_v21, 8  ;;  %491 = vxpose.xlu1.b32.start [1/2] (short) (narrow) %v257_v27, 8 }
 0x132   :  { %492 = vxpose.xlu1.b32.end [2/2] (short) (narrow) %v1017_v25, 8 }
 0x192   :  { %v283_v36 = vpop.trf.xlu0 }
 0x193   :  { %1020 = vmatprep.mubr.msk.f32.mxu1 %vm72_vm0, %v283_v36 }
 0x196   :  { %v315_v37 = vpop.trf.xlu1 }
 0x197   :  { %1021 = vmatmul.mubr.msk.f32.vlgmr.msra.gmra.mrb[4].mxu1 %vm72_vm0, %v315_v37 }
 0x19a   :  { %v347_v38 = vpop.trf.xlu0 }
 0x19b   :  { %1023 = vmatprep.mubr.msk.f32.mxu1 %vm72_vm0, %v347_v38 }
 0x19e   :  { %v379_v39 = vpop.trf.xlu1 }
 0x19f   :  { %1024 = vmatmul.mubr.msk.f32.gmra.mrb[6].mxu1 %vm72_vm0, %v379_v39 }
 0x1a2   :  { %v411_v40 = vpop.trf.xlu0 }
 0x1a3   :  { %1026 = vmatprep.mubr.msk.f32.mxu1 %vm72_vm0, %v411_v40 }
 0x1a6   :  { %v443_v41 = vpop.trf.xlu1 }
 0x1a7   :  { %1027 = vmatmul.mubr.msk.f32.gmra.mrb[8].mxu1 %vm72_vm0, %v443_v41 }
 0x1aa   :  { %v475_v42 = vpop.trf.xlu0 }
 0x1ab   :  { %1029 = vmatprep.mubr.msk.f32.mxu1 %vm72_vm0, %v475_v42 }
 0x1ae   :  { %v507_v43 = vpop.trf.xlu1 }
 0x1af   :  { %1030 = vmatmul.mubr.msk.f32.gmra.mrb[10].mxu1 %vm72_vm0, %v507_v43 }
 0x26a   :  { %v1022_v44 = vpop.f32.mrb[4].mxu1 }
 0x26b   :  { %v616_v45 = vpop.f32.mrb[5].mxu1  ;;  %687 = vxpose.xlu1.b32.start.end [1/1] (short) (narrow) %v1022_v44, 8 }
 0x26c   :  { %655 = vxpose.xlu0.b32.start.end [1/1] (short) (narrow) %v616_v45, 8 }
 0x272   :  { %v1025_v46 = vpop.f32.mrb[6].mxu1 }
 0x273   :  { %v626_v47 = vpop.f32.mrb[7].mxu1  ;;  %751 = vxpose.xlu1.b32.start.end [1/1] (short) (narrow) %v1025_v46, 8 }
 0x274   :  { %719 = vxpose.xlu0.b32.start.end [1/1] (short) (narrow) %v626_v47, 8 }
 0x27a   :  { %v1028_v48 = vpop.f32.mrb[8].mxu1 }
 0x27b   :  { %v636_v49 = vpop.f32.mrb[9].mxu1  ;;  %815 = vxpose.xlu1.b32.start.end [1/1] (short) (narrow) %v1028_v48, 8 }
 0x27c   :  { %783 = vxpose.xlu0.b32.start.end [1/1] (short) (narrow) %v636_v49, 8 }
 0x282   :  { %v1031_v50 = vpop.f32.mrb[10].mxu1 }
 0x283   :  { %879 = vxpose.xlu1.b32.start.end [1/1] (short) (narrow) %v1031_v50, 8  ;;  %v646_v51 = vpop.f32.mrb[11].mxu1 }
 0x284   :  { %847 = vxpose.xlu0.b32.start.end [1/1] (short) (narrow) %v646_v51, 8 }
 0x2eb   :  { %v703_v52 = vpop.trf.xlu1 }
 0x2ec   :  { %v671_v53 = vpop.trf.xlu0  ;;  %913 = vst.msk [vmem:[#allocation8 + $0x8] sm:$0xff] %vm911_vm1, %v703_v52 }
 0x2ed   :  { %912 = vst.msk [vmem:[#allocation8] sm:$0xff] %vm911_vm1, %v671_v53 }
 0x2f3   :  { %v767_v54 = vpop.trf.xlu1 }
 0x2f4   :  { %v735_v55 = vpop.trf.xlu0  ;;  %915 = vst.msk [vmem:[#allocation8 + $0x18] sm:$0xff] %vm911_vm1, %v767_v54 }
 0x2f5   :  { %914 = vst.msk [vmem:[#allocation8 + $0x10] sm:$0xff] %vm911_vm1, %v735_v55 }
 0x2fb   :  { %v831_v56 = vpop.trf.xlu1 }
 0x2fc   :  { %v799_v57 = vpop.trf.xlu0  ;;  %917 = vst.msk [vmem:[#allocation8 + $0x28] sm:$0xff] %vm911_vm1, %v831_v56 }
 0x2fd   :  { %916 = vst.msk [vmem:[#allocation8 + $0x20] sm:$0xff] %vm911_vm1, %v799_v57 }
 0x303   :  { %v895_v58 = vpop.trf.xlu1 }
 0x304   :  { %v863_v59 = vpop.trf.xlu0  ;;  %919 = vst.msk [vmem:[#allocation8 + $0x38] sm:$0xff] %vm911_vm1, %v895_v58 }
 0x305   :  { %918 = vst.msk [vmem:[#allocation8 + $0x30] sm:$0xff] %vm911_vm1, %v863_v59 }
 0x306   :  { %1122 = shalt.err (!%p1119_p0)
}
 0x307   :  { %s1123_s25 = scalar_lea.hbm %s1266_s3, 1024 }
 0x308   :  { %p1124_p1 = scmp.ne.s32.totalorder %s1266_s3, %s1123_s25  ;;  %p1127_p2 = scmp.lt.u32.totalorder %s1123_s25, %s1266_s3 }
 0x30a   :  { %p1129_p3 = pnand %p1127_p2, %p1124_p1 }
 0x30c   :  { %1132 = shalt.err (!%p1129_p3)
}
 0x30d   :  { %931 = dma.vmem_to_hbm [thread:$0]  %s926_s21, 1024, %s1266_s3, [#allocation4], %s1141_s1, %s1141_s1, %s1142_s7  }
 0x30e   :  { %1137 = dma.done.wait [#allocation4], 1024  }
 0x30f   :  { %1138 = vsyncadd [#allocation4], 4294966272 }
 0x310   :  { %935 = vsyncpa [#allocation3], 1 }
 0x311   :  { %936 = vsyncpa [#allocation6], 1 }
 0x312   :  { %937 = vsyncpa [#allocation4], 1 }

// kernel: tpu_custom_call.1
= control target key start
LH: loop header
LB: loop body
LE: loop exit
PB: predicated region body
PF: predicated region fallthrough
CT: control target
= control target key end

     0   :  { %8 = vsyncpa [#allocation3], 0  ;;  %s1271_s0 = inlined_call_operand.hbm [shape: f32[16,8], index: 0, kind: input, shape index: {}]   ;;  %s1272_s1 = inlined_call_operand.hbm [shape: f32[8,16], index: 1, kind: input, shape index: {}]   ;;  %s1273_s2 = inlined_call_operand.hbm [shape: f32[8,16,16], index: 2, kind: input, shape index: {}]   ;;  %s1274_s3 = inlined_call_operand.hbm [shape: f32[8,8,8], index: 3, kind: output, shape index: {}]  }
   0x1   :  { %9 = vsyncpa [#allocation6], 0 }
   0x2   :  { %10 = vsyncpa [#allocation4], 0  ;;  %s1138_s12 = smov [#allocation5]   ;;  %s1139_s14 = smov [#allocation2]  }
   0x3   :  { %s29_s13 = sshll.u32 %s1138_s12, 4  ;;  %s16_s15 = sshll.u32 %s1139_s14, 4  ;;  %s30_s13 = int_to_ptr.vmem [resolvable:$true] %s29_s13  ;;  %s1167_s15 = int_to_ptr.vmem [resolvable:$true] %s16_s15 }
   0x4   :  { %s1044_s18 = scalar_lea.hbm %s1272_s1, 128 }
   0x5   :  { %p1045_p0 = scmp.ne.s32.totalorder %s1272_s1, %s1044_s18  ;;  %p1048_p1 = scmp.lt.u32.totalorder %s1044_s18, %s1272_s1 }
   0x7   :  { %p1050_p2 = pnand %p1048_p1, %p1045_p0 }
   0x9   :  { %1053 = shalt.err (!%p1050_p2)
}
   0xa   :  { %s1054_s23 = scalar_lea.vmem %s30_s13, 128  ;;  %p1059_p4 = scmp.lt.s32.totalorder %s30_s13, %s30_s13 }
   0xb   :  { %p1055_p3 = scmp.ne.s32.totalorder %s30_s13, %s1054_s23  ;;  %p1060_p5 = scmp.lt.s32.totalorder %s1054_s23, %s1054_s23 }
   0xd   :  { %p1061_p6 = por %p1060_p5, %p1059_p4 }
   0xf   :  { %p1062_p7 = pnand %p1061_p6, %p1055_p3 }
  0x11   :  { %1065 = shalt.err (!%p1062_p7)
}
  0x12   :  { %32 = dma.hbm_to_vmem [thread:$0]  %s1272_s1, 128, %s30_s13, [#allocation6]  }
  0x13   :  { %s1066_s28 = scalar_lea.hbm %s1271_s0, 256 }
  0x14   :  { %p1067_p8 = scmp.ne.s32.totalorder %s1271_s0, %s1066_s28  ;;  %p1070_p9 = scmp.lt.u32.totalorder %s1066_s28, %s1271_s0 }
  0x16   :  { %p1072_p10 = pnand %p1070_p9, %p1067_p8 }
  0x18   :  { %1075 = shalt.err (!%p1072_p10)
}
  0x19   :  { %s1076_s6 = scalar_lea.vmem %s1167_s15, 256  ;;  %p1081_p12 = scmp.lt.s32.totalorder %s1167_s15, %s1167_s15 }
  0x1a   :  { %p1077_p11 = scmp.ne.s32.totalorder %s1167_s15, %s1076_s6  ;;  %p1082_p13 = scmp.lt.s32.totalorder %s1076_s6, %s1076_s6 }
  0x1c   :  { %p1083_p0 = por %p1082_p13, %p1081_p12 }
  0x1e   :  { %p1084_p1 = pnand %p1083_p0, %p1077_p11 }
  0x20   :  { %1087 = shalt.err (!%p1084_p1)
}
  0x21   :  { %s1140_s1 = smov 128   ;;  %s1141_s7 = smov 8  }
  0x22   :  { %22 = dma.hbm_to_vmem [thread:$0]  %s1271_s0, 256, %s1167_s15, [#allocation3], %s1140_s1, %s1140_s1, %s1141_s7  }
  0x23   :  { %s1142_s10 = smov [#allocation7]   ;;  %s1088_s14 = scalar_lea.hbm %s1273_s2, 2048 }
  0x24   :  { %s38_s11 = sshll.u32 %s1142_s10, 4  ;;  %p1089_p2 = scmp.ne.s32.totalorder %s1273_s2, %s1088_s14  ;;  %s39_s11 = int_to_ptr.vmem [resolvable:$true] %s38_s11 }
  0x25   :  { %p1092_p3 = scmp.lt.u32.totalorder %s1088_s14, %s1273_s2 }
  0x27   :  { %p1094_p4 = pnand %p1092_p3, %p1089_p2 }
  0x29   :  { %1097 = shalt.err (!%p1094_p4)
}
  0x2a   :  { %s1098_s20 = scalar_lea.vmem %s39_s11, 2048  ;;  %p1103_p6 = scmp.lt.s32.totalorder %s39_s11, %s39_s11 }
  0x2b   :  { %p1099_p5 = scmp.ne.s32.totalorder %s39_s11, %s1098_s20  ;;  %p1104_p7 = scmp.lt.s32.totalorder %s1098_s20, %s1098_s20 }
  0x2d   :  { %p1105_p8 = por %p1104_p7, %p1103_p6 }
  0x2f   :  { %p1106_p9 = pnand %p1105_p8, %p1099_p5 }
  0x31   :  { %1109 = shalt.err (!%p1106_p9)
}
  0x32   :  { %44 = dma.hbm_to_vmem [thread:$0]  %s1273_s2, 2048, %s39_s11, [#allocation6], %s1140_s1, %s1140_s1, %s1141_s7  }
  0x33   :  { %1132 = dma.done.wait [#allocation3], 256  }
  0x34   :  { %1133 = vsyncadd [#allocation3], 4294967040 }
  0x35   :  { %1134 = dma.done.wait [#allocation6], 2176  }
  0x36   :  { %1135 = vsyncadd [#allocation6], 4294965120  ;;  %vm72_vm0 = vcmask 130048   ;;  %v70_v0 = vld [vmem:[#allocation2] sm:$0xff]  ;;  %v71_v1 = vld [vmem:[#allocation2 + $0x8] sm:$0xff]  ;;  %v1143_v19 = vmov 0.0|0.0  }
  0x37   :  { %v54_v2 = vld [vmem:[#allocation7] sm:$0xff]  ;;  %v1007_v3 = vpack.c.bf16 %v71_v1, %v70_v0  ;;  %v55_v4 = vld [vmem:[#allocation7 + $0x8] sm:$0xff]  ;;  %v56_v5 = vld [vmem:[#allocation7 + $0x10] sm:$0xff]  ;;  %1011 = vmatprep.subr.bf16.mxu1 %v1143_v19  ;;  %vm1144_vm1 = vmmov 0   ;;  %v1145_v20 = vmov 0.0   ;;  %vm830_vm2 = vcmask 64512  }
  0x38   :  { %927 = vmatprep.mubr.msk.f32.mxu0 %vm72_vm0, %v54_v2  ;;  %v57_v6 = vld [vmem:[#allocation7 + $0x18] sm:$0xff]  ;;  %v58_v7 = vld [vmem:[#allocation7 + $0x20] sm:$0xff]  ;;  %v59_v8 = vld [vmem:[#allocation7 + $0x28] sm:$0xff]  ;;  %955 = vmatprep.mubr.msk.f32.mxu1 %vm1144_vm1, %v1145_v20  ;;  %s1146_s2 = smov [#allocation8]  }
  0x39   :  { %1008 = vmatprep.subr.bf16.mxu0 %v1007_v3  ;;  %v60_v9 = vld [vmem:[#allocation7 + $0x30] sm:$0xff]  ;;  %v61_v10 = vld [vmem:[#allocation7 + $0x38] sm:$0xff]  ;;  %v62_v11 = vld [vmem:[#allocation7 + $0x40] sm:$0xff]  ;;  %s844_s21 = sshll.u32 %s1146_s2, 4  ;;  %s845_s21 = int_to_ptr.vmem [resolvable:$true] %s844_s21 }
  0x3a   :  { %1010 = vmatpush3.bf16.msra.mxu0 %v1007_v3  ;;  %v63_v12 = vld [vmem:[#allocation7 + $0x48] sm:$0xff]  ;;  %v64_v13 = vld [vmem:[#allocation7 + $0x50] sm:$0xff]  ;;  %v65_v14 = vld [vmem:[#allocation7 + $0x58] sm:$0xff]  ;;  %s1110_s22 = scalar_lea.vmem %s845_s21, 1024  ;;  %p1115_p11 = scmp.lt.s32.totalorder %s845_s21, %s845_s21 }
  0x3b   :  { %v66_v15 = vld [vmem:[#allocation7 + $0x60] sm:$0xff]  ;;  %v67_v16 = vld [vmem:[#allocation7 + $0x68] sm:$0xff]  ;;  %v68_v17 = vld [vmem:[#allocation7 + $0x70] sm:$0xff]  ;;  %p1111_p10 = scmp.ne.s32.totalorder %s845_s21, %s1110_s22  ;;  %p1116_p12 = scmp.lt.s32.totalorder %s1110_s22, %s1110_s22 }
  0x3c   :  { %v69_v18 = vld [vmem:[#allocation7 + $0x78] sm:$0xff] }
  0x3d   :  { %928 = vmatmul.mubr.msk.f32.vlgmr.msra.gmra.mrb[0].mxu0 %vm72_vm0, %v55_v4  ;;  %v266_v25 = vld [vmem:[#allocation5] sm:$0xff]  ;;  %p1117_p13 = por %p1116_p12, %p1115_p11 }
  0x3e   :  { %930 = vmatprep.mubr.msk.f32.mxu0 %vm72_vm0, %v56_v5 }
  0x3f   :  { %p1118_p0 = pnand %p1117_p13, %p1111_p10 }
  0x41   :  { %931 = vmatmul.mubr.msk.f32.gmra.mrb[2].mxu0 %vm72_vm0, %v57_v6 }
  0x42   :  { %933 = vmatprep.mubr.msk.f32.mxu0 %vm72_vm0, %v58_v7 }
  0x45   :  { %934 = vmatmul.mubr.msk.f32.gmra.mrb[4].mxu0 %vm72_vm0, %v59_v8 }
  0x46   :  { %936 = vmatprep.mubr.msk.f32.mxu0 %vm72_vm0, %v60_v9 }
  0x49   :  { %937 = vmatmul.mubr.msk.f32.gmra.mrb[6].mxu0 %vm72_vm0, %v61_v10 }
  0x4a   :  { %939 = vmatprep.mubr.msk.f32.mxu0 %vm72_vm0, %v62_v11 }
  0x4d   :  { %940 = vmatmul.mubr.msk.f32.gmra.mrb[8].mxu0 %vm72_vm0, %v63_v12 }
  0x4e   :  { %942 = vmatprep.mubr.msk.f32.mxu0 %vm72_vm0, %v64_v13 }
  0x51   :  { %943 = vmatmul.mubr.msk.f32.gmra.mrb[10].mxu0 %vm72_vm0, %v65_v14 }
  0x52   :  { %945 = vmatprep.mubr.msk.f32.mxu0 %vm72_vm0, %v66_v15 }
  0x55   :  { %946 = vmatmul.mubr.msk.f32.gmra.mrb[12].mxu0 %vm72_vm0, %v67_v16 }
  0x56   :  { %948 = vmatprep.mubr.msk.f32.mxu0 %vm72_vm0, %v68_v17 }
  0x59   :  { %949 = vmatmul.mubr.msk.f32.gmra.mrb[14].mxu0 %vm72_vm0, %v69_v18 }
 0x110   :  { %v929_v21 = vpop.f32.mrb[0].mxu0 }
 0x111   :  { %v187_v22 = vpop.f32.mrb[1].mxu0 }
 0x112   :  { %v1012_v23 = vpack.c.bf16 %v929_v21, %v187_v22 }
 0x114   :  { %v932_v24 = vpop.f32.mrb[2].mxu0  ;;  %1013 = vmatpush3.bf16.msra.mxu1 %v1012_v23 }
 0x115   :  { %v197_v26 = vpop.f32.mrb[3].mxu0  ;;  %1014 = vmatprep.subr.bf16.mxu1 %v1143_v19 }
 0x116   :  { %v1015_v27 = vpack.c.bf16 %v932_v24, %v197_v26 }
 0x117   :  { %956 = vmatmul.mubr.msk.f32.vlgmr.msra.gmra.mrb[0].mxu1 %vm72_vm0, %v266_v25 }
 0x118   :  { %v935_v28 = vpop.f32.mrb[4].mxu0  ;;  %1016 = vmatpush3.bf16.msra.mxu1 %v1015_v27  ;;  %962 = vmatprep.mubr.msk.f32.mxu1 %vm1144_vm1, %v1145_v20 }
 0x119   :  { %v207_v29 = vpop.f32.mrb[5].mxu0  ;;  %1017 = vmatprep.subr.bf16.mxu1 %v1143_v19 }
 0x11a   :  { %v1018_v30 = vpack.c.bf16 %v935_v28, %v207_v29 }
 0x11b   :  { %963 = vmatmul.mubr.msk.f32.vlgmr.msra.gmra.mrb[2].mxu1 %vm72_vm0, %v266_v25 }
 0x11c   :  { %v938_v31 = vpop.f32.mrb[6].mxu0  ;;  %1019 = vmatpush3.bf16.msra.mxu1 %v1018_v30  ;;  %969 = vmatprep.mubr.msk.f32.mxu1 %vm1144_vm1, %v1145_v20 }
 0x11d   :  { %v217_v32 = vpop.f32.mrb[7].mxu0  ;;  %1020 = vmatprep.subr.bf16.mxu1 %v1143_v19 }
 0x11e   :  { %v1021_v33 = vpack.c.bf16 %v938_v31, %v217_v32 }
 0x11f   :  { %970 = vmatmul.mubr.msk.f32.vlgmr.msra.gmra.mrb[4].mxu1 %vm72_vm0, %v266_v25 }
 0x120   :  { %v941_v34 = vpop.f32.mrb[8].mxu0  ;;  %1022 = vmatpush3.bf16.msra.mxu1 %v1021_v33  ;;  %976 = vmatprep.mubr.msk.f32.mxu1 %vm1144_vm1, %v1145_v20 }
 0x121   :  { %v227_v35 = vpop.f32.mrb[9].mxu0  ;;  %1023 = vmatprep.subr.bf16.mxu1 %v1143_v19 }
 0x122   :  { %v1024_v36 = vpack.c.bf16 %v941_v34, %v227_v35 }
 0x123   :  { %977 = vmatmul.mubr.msk.f32.vlgmr.msra.gmra.mrb[6].mxu1 %vm72_vm0, %v266_v25 }
 0x124   :  { %v944_v37 = vpop.f32.mrb[10].mxu0  ;;  %1025 = vmatpush3.bf16.msra.mxu1 %v1024_v36  ;;  %983 = vmatprep.mubr.msk.f32.mxu1 %vm1144_vm1, %v1145_v20 }
 0x125   :  { %v237_v38 = vpop.f32.mrb[11].mxu0  ;;  %1026 = vmatprep.subr.bf16.mxu1 %v1143_v19 }
 0x126   :  { %v1027_v39 = vpack.c.bf16 %v944_v37, %v237_v38 }
 0x127   :  { %984 = vmatmul.mubr.msk.f32.vlgmr.msra.gmra.mrb[8].mxu1 %vm72_vm0, %v266_v25 }
 0x128   :  { %v947_v40 = vpop.f32.mrb[12].mxu0  ;;  %1028 = vmatpush3.bf16.msra.mxu1 %v1027_v39  ;;  %990 = vmatprep.mubr.msk.f32.mxu1 %vm1144_vm1, %v1145_v20 }
 0x129   :  { %v247_v41 = vpop.f32.mrb[13].mxu0  ;;  %1029 = vmatprep.subr.bf16.mxu1 %v1143_v19 }
 0x12a   :  { %v1030_v42 = vpack.c.bf16 %v947_v40, %v247_v41 }
 0x12b   :  { %991 = vmatmul.mubr.msk.f32.vlgmr.msra.gmra.mrb[10].mxu1 %vm72_vm0, %v266_v25 }
 0x12c   :  { %v950_v43 = vpop.f32.mrb[14].mxu0  ;;  %1031 = vmatpush3.bf16.msra.mxu1 %v1030_v42  ;;  %997 = vmatprep.mubr.msk.f32.mxu1 %vm1144_vm1, %v1145_v20 }
 0x12d   :  { %v257_v44 = vpop.f32.mrb[15].mxu0  ;;  %1032 = vmatprep.subr.bf16.mxu1 %v1143_v19 }
 0x12e   :  { %v1033_v45 = vpack.c.bf16 %v950_v43, %v257_v44 }
 0x12f   :  { %998 = vmatmul.mubr.msk.f32.vlgmr.msra.gmra.mrb[12].mxu1 %vm72_vm0, %v266_v25 }
 0x130   :  { %1034 = vmatpush3.bf16.msra.mxu1 %v1033_v45  ;;  %1004 = vmatprep.mubr.msk.f32.mxu1 %vm1144_vm1, %v1145_v20 }
 0x133   :  { %1005 = vmatmul.mubr.msk.f32.vlgmr.msra.gmra.mrb[14].mxu1 %vm72_vm0, %v266_v25 }
 0x1ea   :  { %v336_v46 = vpop.f32.mrb[0].mxu1 }
 0x1eb   :  { %831 = vst.msk [vmem:[#allocation8] sm:$0xff] %vm830_vm2, %v336_v46  ;;  %v957_v47 = vpop.f32.mrb[1].mxu1 }
 0x1ee   :  { %v406_v48 = vpop.f32.mrb[2].mxu1 }
 0x1ef   :  { %832 = vst.msk [vmem:[#allocation8 + $0x8] sm:$0xff] %vm830_vm2, %v406_v48  ;;  %v964_v49 = vpop.f32.mrb[3].mxu1 }
 0x1f2   :  { %v476_v50 = vpop.f32.mrb[4].mxu1 }
 0x1f3   :  { %833 = vst.msk [vmem:[#allocation8 + $0x10] sm:$0xff] %vm830_vm2, %v476_v50  ;;  %v971_v51 = vpop.f32.mrb[5].mxu1 }
 0x1f6   :  { %v546_v52 = vpop.f32.mrb[6].mxu1 }
 0x1f7   :  { %834 = vst.msk [vmem:[#allocation8 + $0x18] sm:$0xff] %vm830_vm2, %v546_v52  ;;  %v978_v53 = vpop.f32.mrb[7].mxu1 }
 0x1fa   :  { %v616_v54 = vpop.f32.mrb[8].mxu1 }
 0x1fb   :  { %835 = vst.msk [vmem:[#allocation8 + $0x20] sm:$0xff] %vm830_vm2, %v616_v54  ;;  %v985_v55 = vpop.f32.mrb[9].mxu1 }
 0x1fe   :  { %v686_v56 = vpop.f32.mrb[10].mxu1 }
 0x1ff   :  { %836 = vst.msk [vmem:[#allocation8 + $0x28] sm:$0xff] %vm830_vm2, %v686_v56  ;;  %v992_v57 = vpop.f32.mrb[11].mxu1 }
 0x202   :  { %v756_v58 = vpop.f32.mrb[12].mxu1 }
 0x203   :  { %837 = vst.msk [vmem:[#allocation8 + $0x30] sm:$0xff] %vm830_vm2, %v756_v58  ;;  %v999_v59 = vpop.f32.mrb[13].mxu1 }
 0x206   :  { %v826_v60 = vpop.f32.mrb[14].mxu1 }
 0x207   :  { %838 = vst.msk [vmem:[#allocation8 + $0x38] sm:$0xff] %vm830_vm2, %v826_v60  ;;  %v1006_v61 = vpop.f32.mrb[15].mxu1 }
 0x208   :  { %1121 = shalt.err (!%p1118_p0)
}
 0x209   :  { %s1122_s25 = scalar_lea.hbm %s1274_s3, 1024 }
 0x20a   :  { %p1123_p1 = scmp.ne.s32.totalorder %s1274_s3, %s1122_s25  ;;  %p1126_p2 = scmp.lt.u32.totalorder %s1122_s25, %s1274_s3 }
 0x20c   :  { %p1128_p3 = pnand %p1126_p2, %p1123_p1 }
 0x20e   :  { %1131 = shalt.err (!%p1128_p3)
}
 0x20f   :  { %850 = dma.vmem_to_hbm [thread:$0]  %s845_s21, 1024, %s1274_s3, [#allocation4], %s1140_s1, %s1140_s1, %s1141_s7  }
 0x210   :  { %1136 = dma.done.wait [#allocation4], 1024  }
 0x211   :  { %1137 = vsyncadd [#allocation4], 4294966272 }
 0x212   :  { %854 = vsyncpa [#allocation3], 1 }
 0x213   :  { %855 = vsyncpa [#allocation6], 1 }
 0x214   :  { %856 = vsyncpa [#allocation4], 1 }

</bundles_post_ra>
